<compile_context>
chip_gen: v5e
topology: v5e:2x2
jax: 0.10.0
libtpu: 0.0.40
codegen_flags: <defaults>
</compile_context>

<pallas_src>
import math
from functools import partial

import jax
import jax.numpy as jnp
from jax.experimental import pallas as pl
from jax.experimental.pallas import tpu as pltpu

# embedded feature width: 17 (lat) + 17 (lon) + 16 (date) + 17 (sst) + 1 (last col)
INPUT_SIZE = 68
OUT_SIZE = 300
PI = math.pi

# ~66 FLOP/byte -> HBM-bound on every TPU generation; large tiles amortize the
# ~0.35 us per-grid-step overhead. At TB=4096 the live VMEM set is ~20-25 MB
# (f32 out double-buffer ~9.8 MB + bf16 input ~1.1 MB + f32 intermediates),
# which fits every generation's *physical* VMEM once the scoped limit is raised.
TB_MAX = 4096
VMEM_LIMIT_BYTES = 48 * 1024 * 1024  # > default scoped limits, < v7x 64 MiB physical


def mlpe_kernel(emb_ref, w13_ref, fb1_ref, w2_ref, fb2_ref,
                w3b_ref, fb3_ref, w4_ref, b4_ref, out_ref):
    emb = emb_ref[...]  # [TB, 68] bf16

    # Fused emb-LHS matmul: lanes 0:64 = mlp1.Linear(68,64) pre-activation,
    # lanes 64:128 = emb contribution to mlp2.Linear(196,64).
    t = jnp.dot(emb, w13_ref[...], preferred_element_type=jnp.float32)  # [TB,128] f32

    # mlp1: Linear -> GaussianRBF(64) -> Linear -> Dropout(id) -> GaussianRBF(128)
    # Everything stays 128 lanes wide; the zero-padded weights annihilate the
    # unused half, so there are no 64-lane slices / relayouts in the kernel.
    d1 = t + fb1_ref[...]                    # lanes 0:64 valid (fb1 = b1 - rb1, rest 0)
    h1 = jnp.exp(-PI * d1 * d1)              # RBF in f32
    d2 = (jnp.dot(h1.astype(jnp.bfloat16), w2_ref[...],
                  preferred_element_type=jnp.float32) + fb2_ref[...])
    h2 = jnp.exp(-PI * d2 * d2)

    # mlp2 on concat([emb, h2]): emb part already sits in t lanes 64:128 and
    # w3b is column-padded so h2 @ w3b lands in those same lanes.
    d3 = (t + jnp.dot(h2.astype(jnp.bfloat16), w3b_ref[...],
                      preferred_element_type=jnp.float32) + fb3_ref[...])
    h3 = jnp.exp(-PI * d3 * d3)              # lanes 64:128 valid

    out_ref[...] = (jnp.dot(h3.astype(jnp.bfloat16), w4_ref[...],
                            preferred_element_type=jnp.float32)
                    + b4_ref[...]).astype(out_ref.dtype)


def init_params(key):
    ks = jax.random.split(key, 16)
    n = lambda k, shape, s=0.1: (s * jax.random.normal(k, shape)).astype(jnp.float32)
    return {
        # embedding tables (nn.Embedding default ~ N(0,1); scaled for stability)
        "emb_lat": n(ks[0], (90, 16)),
        "emb_lon": n(ks[1], (360, 16)),
        "emb_sst": n(ks[2], (64, 16)),
        "emb_date": n(ks[3], (8192, 16)),
        # mlp1
        "w1": n(ks[4], (INPUT_SIZE, 64)),
        "b1": n(ks[5], (1, 64)),
        "rb1": n(ks[6], (1, 64), 1.0),      # GaussianRBF(64).b
        "w2": n(ks[7], (64, 128)),
        "b2": n(ks[8], (1, 128)),
        "rb2": n(ks[9], (1, 128), 1.0),     # GaussianRBF(128).b
        # mlp2
        "w3": n(ks[10], (128 + INPUT_SIZE, 64)),
        "b3": n(ks[11], (1, 64)),
        "rb3": n(ks[12], (1, 64), 1.0),     # GaussianRBF(64).b
        "w4": n(ks[13], (64, OUT_SIZE)),
        "b4": n(ks[14], (1, OUT_SIZE)),
    }


def pack_params(params):
    """One-time preprocessing: weight fusion, 128-lane zero-padding, bias/RBF
    folding and bf16 casts."""
    bf16, f32 = jnp.bfloat16, jnp.float32
    z64 = jnp.zeros((1, 64), f32)
    w3a = params["w3"][:INPUT_SIZE]   # (68, 64)  — emb half of mlp2.Linear
    w3b = params["w3"][INPUT_SIZE:]   # (128, 64) — h2 half of mlp2.Linear
    # Fuse mlp1.Linear and the emb half of mlp2.Linear into one (68,128) matmul.
    w13 = jnp.concatenate([params["w1"], w3a], axis=1)
    # Zero-pad the remaining weights so every intermediate is full 128 lanes.
    w2p = jnp.concatenate([params["w2"], jnp.zeros((64, 128), f32)], axis=0)        # (128,128)
    w3bp = jnp.concatenate([jnp.zeros((128, 64), f32), w3b], axis=1)                # (128,128)
    w4p = jnp.concatenate([jnp.zeros((64, OUT_SIZE), f32), params["w4"]], axis=0)   # (128,300)
    return {
        "emb_lat": params["emb_lat"], "emb_lon": params["emb_lon"],
        "emb_sst": params["emb_sst"], "emb_date": params["emb_date"],
        "w13": w13.astype(bf16),
        "fb1": jnp.concatenate([params["b1"] - params["rb1"], z64], axis=1),   # (1,128) f32
        "w2": w2p.astype(bf16),
        "fb2": (params["b2"] - params["rb2"]).astype(f32),                     # (1,128)
        "w3b": w3bp.astype(bf16),
        "fb3": jnp.concatenate([z64, params["b3"] - params["rb3"]], axis=1),   # (1,128) f32
        "w4": w4p.astype(bf16),
        "b4": params["b4"].astype(f32),                                        # (1,300)
    }


def _round_up(x, m):
    return ((x + m - 1) // m) * m


def _choose_tile(rows):
    # Aim for >= 2 grid steps so the batch axis can shard across both v7x
    # TensorCores, while keeping tiles as big as possible to amortize the
    # per-grid-step overhead; TB_MAX keeps the live set inside v7x's 64 MiB VMEM.
    tb = _round_up(pl.cdiv(rows, 2), 16)   # 16-row sublane tile for bf16 input
    return max(16, min(TB_MAX, tb))


@partial(jax.jit, static_argnames=("out_dtype",))
def mlpe_forward(x, packed, out_dtype=jnp.float32):
    # x: [B, 5] float32, columns = (lat, lon, date, sst, extra_feature)
    lat, lon, date, sst, feat = (x[:, 0], x[:, 1], x[:, 2], x[:, 3], x[:, -1])

    def trunc_frac(v):
        t = jnp.trunc(v)
        return t.astype(jnp.int32), (v - t)[:, None]

    lat_i, lat_f = trunc_frac(lat)
    lon_i, lon_f = trunc_frac(lon)
    sst_i, sst_f = trunc_frac(sst)
    date_i = date.astype(jnp.int32)
    # NOTE: XLA gather clamps out-of-range indices instead of erroring like
    # torch.nn.Embedding; inputs are assumed in-range as in the reference model.

    # TODO(synk): if profiling still shows this gather/concat stage dominating
    # after the memory-side fixes, move the 4 table lookups in-kernel (tables
    # ~280 KB in bf16, VMEM-resident via constant BlockSpecs; per-tile indices
    # via PrefetchScalarGridSpec) and build the 68-lane row in VMEM instead of
    # materializing `embedded` in HBM.
    embedded = jnp.concatenate(
        [packed["emb_lat"][lat_i], lat_f,
         packed["emb_lon"][lon_i], lon_f,
         packed["emb_date"][date_i],
         packed["emb_sst"][sst_i], sst_f,
         feat[:, None]], axis=1).astype(jnp.bfloat16)          # [B, 68]

    B = embedded.shape[0]
    if B < 16:
        # Tiny batches: pad to one minimal sublane tile (negligible traffic).
        rows = 16
        embedded = jnp.pad(embedded, ((0, rows - B), (0, 0)))
    else:
        # No jnp.pad / out[:B] round trips: Pallas masks the ragged last block
        # (rows are independent; out-of-bounds writes are dropped), so the only
        # HBM traffic is the kernel's own read + write.
        rows = B

    tb = _choose_tile(rows)

    const = lambda i: (0, 0)                # weights/biases: DMA'd once, VMEM-resident
    out = pl.pallas_call(
        mlpe_kernel,
        out_shape=jax.ShapeDtypeStruct((rows, OUT_SIZE), out_dtype),
        grid=(pl.cdiv(rows, tb),),
        in_specs=[
            pl.BlockSpec((tb, INPUT_SIZE), lambda i: (i, 0)),
            pl.BlockSpec(packed["w13"].shape, const),
            pl.BlockSpec(packed["fb1"].shape, const),
            pl.BlockSpec(packed["w2"].shape, const),
            pl.BlockSpec(packed["fb2"].shape, const),
            pl.BlockSpec(packed["w3b"].shape, const),
            pl.BlockSpec(packed["fb3"].shape, const),
            pl.BlockSpec(packed["w4"].shape, const),
            pl.BlockSpec(packed["b4"].shape, const),
        ],
        out_specs=pl.BlockSpec((tb, OUT_SIZE), lambda i: (i, 0)),
        compiler_params=pltpu.CompilerParams(
            dimension_semantics=("parallel",),        # megacore sharding on v7x
            vmem_limit_bytes=VMEM_LIMIT_BYTES),
    )(embedded,
      packed["w13"], packed["fb1"], packed["w2"], packed["fb2"],
      packed["w3b"], packed["fb3"], packed["w4"], packed["b4"])
    return out if rows == B else out[:B]


def mlpe_reference(x, params):
    """Pure f32 JAX port of the PyTorch forward (for validation)."""
    lat, lon, date, sst, feat = (x[:, 0], x[:, 1], x[:, 2], x[:, 3], x[:, -1])

    def trunc_frac(v):
        t = jnp.trunc(v)
        return t.astype(jnp.int32), (v - t)[:, None]

    lat_i, lat_f = trunc_frac(lat)
    lon_i, lon_f = trunc_frac(lon)
    sst_i, sst_f = trunc_frac(sst)
    date_i = date.astype(jnp.int32)
    emb = jnp.concatenate(
        [params["emb_lat"][lat_i], lat_f,
         params["emb_lon"][lon_i], lon_f,
         params["emb_date"][date_i],
         params["emb_sst"][sst_i], sst_f,
         feat[:, None]], axis=1)

    rbf = lambda v, b: jnp.exp(-PI * (v - b) ** 2)
    h1 = rbf(emb @ params["w1"] + params["b1"], params["rb1"])
    h2 = rbf(h1 @ params["w2"] + params["b2"], params["rb2"])          # dropout = id
    comb = jnp.concatenate([emb, h2], axis=1)
    h3 = rbf(comb @ params["w3"] + params["b3"], params["rb3"])        # dropout = id
    return h3 @ params["w4"] + params["b4"]


if __name__ == "__main__":
    key = jax.random.PRNGKey(0)
    k_param, k0, k1, k2, k3, k4 = jax.random.split(key, 6)
    params = init_params(k_param)
    packed = pack_params(params)

    B = 24   # small, and exercises a 2-step grid with a ragged (masked) last block
    lat = jax.random.uniform(k0, (B,), minval=0.0, maxval=89.9)
    lon = jax.random.uniform(k1, (B,), minval=0.0, maxval=359.9)
    date = jax.random.randint(k2, (B,), 0, 8192).astype(jnp.float32)
    sst = jax.random.uniform(k3, (B,), minval=0.0, maxval=63.9)
    feat = jax.random.normal(k4, (B,))
    x = jnp.stack([lat, lon, date, sst, feat], axis=1).astype(jnp.float32)

    out = mlpe_forward(x, packed)
    jax.block_until_ready(out)
    assert out.shape == (B, OUT_SIZE) and out.dtype == jnp.float32

    # bf16 matmuls (f32 accumulation) vs pure-f32 reference -> loose tolerance.
    ref = mlpe_reference(x, params)
    max_err = float(jnp.max(jnp.abs(out - ref)))
    assert max_err < 0.25, f"kernel vs f32 reference max abs err {max_err}"
    print("KERNEL_OK")
</pallas_src>

<mosaic_0001>
module attributes {stable_mosaic.version = 11 : i64} {
  func.func @mlpe_kernel(%arg0: i32, %arg1: memref<16x68xbf16, #tpu.memory_space<vmem>>, %arg2: memref<68x128xbf16, #tpu.memory_space<vmem>>, %arg3: memref<1x128xf32, #tpu.memory_space<vmem>>, %arg4: memref<128x128xbf16, #tpu.memory_space<vmem>>, %arg5: memref<1x128xf32, #tpu.memory_space<vmem>>, %arg6: memref<128x128xbf16, #tpu.memory_space<vmem>>, %arg7: memref<1x128xf32, #tpu.memory_space<vmem>>, %arg8: memref<128x300xbf16, #tpu.memory_space<vmem>>, %arg9: memref<1x300xf32, #tpu.memory_space<vmem>>, %arg10: memref<16x300xf32, #tpu.memory_space<vmem>>) attributes {dimension_semantics = [#tpu.dimension_semantics<parallel>], iteration_bounds = array<i64: 2>, scalar_prefetch = 0 : i64, scratch_operands = 0 : i64, tpu.core_type = #tpu.core_type<tc>, window_params = [{transform_indices = @transform_0, window_bounds = array<i64: 16, 68>}, {pipeline_mode = #tpu.pipeline_mode<synchronous>, transform_indices = @transform_1, window_bounds = array<i64: 68, 128>}, {pipeline_mode = #tpu.pipeline_mode<synchronous>, transform_indices = @transform_2, window_bounds = array<i64: 1, 128>}, {pipeline_mode = #tpu.pipeline_mode<synchronous>, transform_indices = @transform_3, window_bounds = array<i64: 128, 128>}, {pipeline_mode = #tpu.pipeline_mode<synchronous>, transform_indices = @transform_4, window_bounds = array<i64: 1, 128>}, {pipeline_mode = #tpu.pipeline_mode<synchronous>, transform_indices = @transform_5, window_bounds = array<i64: 128, 128>}, {pipeline_mode = #tpu.pipeline_mode<synchronous>, transform_indices = @transform_6, window_bounds = array<i64: 1, 128>}, {pipeline_mode = #tpu.pipeline_mode<synchronous>, transform_indices = @transform_7, window_bounds = array<i64: 128, 300>}, {pipeline_mode = #tpu.pipeline_mode<synchronous>, transform_indices = @transform_8, window_bounds = array<i64: 1, 300>}, {transform_indices = @transform_9, window_bounds = array<i64: 16, 300>}]} {
    %c0 = arith.constant 0 : index
    %c0_0 = arith.constant 0 : index
    %0 = vector.load %arg1[%c0, %c0_0] : memref<16x68xbf16, #tpu.memory_space<vmem>>, vector<16x68xbf16>
    %c0_1 = arith.constant 0 : index
    %c0_2 = arith.constant 0 : index
    %1 = vector.load %arg2[%c0_1, %c0_2] : memref<68x128xbf16, #tpu.memory_space<vmem>>, vector<68x128xbf16>
    %cst = arith.constant dense<0.000000e+00> : vector<16x128xf32>
    %2 = tpu.matmul %0, %1, %cst {dimension_numbers = #tpu.dot_dimension_numbers<[1], [0], [0], [1], [0, 0, 1, 1], [], []>} : vector<16x68xbf16>, vector<68x128xbf16>, vector<16x128xf32> -> vector<16x128xf32>
    %c0_3 = arith.constant 0 : index
    %c0_4 = arith.constant 0 : index
    %3 = vector.load %arg3[%c0_3, %c0_4] : memref<1x128xf32, #tpu.memory_space<vmem>>, vector<1x128xf32>
    %4 = vector.broadcast %3 : vector<1x128xf32> to vector<16x128xf32>
    %5 = arith.addf %2, %4 : vector<16x128xf32>
    %cst_5 = arith.constant -3.14159274 : f32
    %6 = vector.broadcast %cst_5 : f32 to vector<16x128xf32>
    %7 = arith.mulf %6, %5 : vector<16x128xf32>
    %8 = arith.mulf %7, %5 : vector<16x128xf32>
    %9 = math.exp %8 : vector<16x128xf32>
    %10 = arith.truncf %9 : vector<16x128xf32> to vector<16x128xbf16>
    %c0_6 = arith.constant 0 : index
    %c0_7 = arith.constant 0 : index
    %11 = vector.load %arg4[%c0_6, %c0_7] : memref<128x128xbf16, #tpu.memory_space<vmem>>, vector<128x128xbf16>
    %cst_8 = arith.constant dense<0.000000e+00> : vector<16x128xf32>
    %12 = tpu.matmul %10, %11, %cst_8 {dimension_numbers = #tpu.dot_dimension_numbers<[1], [0], [0], [1], [0, 0, 1, 1], [], []>} : vector<16x128xbf16>, vector<128x128xbf16>, vector<16x128xf32> -> vector<16x128xf32>
    %c0_9 = arith.constant 0 : index
    %c0_10 = arith.constant 0 : index
    %13 = vector.load %arg5[%c0_9, %c0_10] : memref<1x128xf32, #tpu.memory_space<vmem>>, vector<1x128xf32>
    %14 = vector.broadcast %13 : vector<1x128xf32> to vector<16x128xf32>
    %15 = arith.addf %12, %14 : vector<16x128xf32>
    %cst_11 = arith.constant -3.14159274 : f32
    %16 = vector.broadcast %cst_11 : f32 to vector<16x128xf32>
    %17 = arith.mulf %16, %15 : vector<16x128xf32>
    %18 = arith.mulf %17, %15 : vector<16x128xf32>
    %19 = math.exp %18 : vector<16x128xf32>
    %20 = arith.truncf %19 : vector<16x128xf32> to vector<16x128xbf16>
    %c0_12 = arith.constant 0 : index
    %c0_13 = arith.constant 0 : index
    %21 = vector.load %arg6[%c0_12, %c0_13] : memref<128x128xbf16, #tpu.memory_space<vmem>>, vector<128x128xbf16>
    %cst_14 = arith.constant dense<0.000000e+00> : vector<16x128xf32>
    %22 = tpu.matmul %20, %21, %cst_14 {dimension_numbers = #tpu.dot_dimension_numbers<[1], [0], [0], [1], [0, 0, 1, 1], [], []>} : vector<16x128xbf16>, vector<128x128xbf16>, vector<16x128xf32> -> vector<16x128xf32>
    %23 = arith.addf %2, %22 : vector<16x128xf32>
    %c0_15 = arith.constant 0 : index
    %c0_16 = arith.constant 0 : index
    %24 = vector.load %arg7[%c0_15, %c0_16] : memref<1x128xf32, #tpu.memory_space<vmem>>, vector<1x128xf32>
    %25 = vector.broadcast %24 : vector<1x128xf32> to vector<16x128xf32>
    %26 = arith.addf %23, %25 : vector<16x128xf32>
    %cst_17 = arith.constant -3.14159274 : f32
    %27 = vector.broadcast %cst_17 : f32 to vector<16x128xf32>
    %28 = arith.mulf %27, %26 : vector<16x128xf32>
    %29 = arith.mulf %28, %26 : vector<16x128xf32>
    %30 = math.exp %29 : vector<16x128xf32>
    %31 = arith.truncf %30 : vector<16x128xf32> to vector<16x128xbf16>
    %c0_18 = arith.constant 0 : index
    %c0_19 = arith.constant 0 : index
    %32 = vector.load %arg8[%c0_18, %c0_19] : memref<128x300xbf16, #tpu.memory_space<vmem>>, vector<128x300xbf16>
    %cst_20 = arith.constant dense<0.000000e+00> : vector<16x300xf32>
    %33 = tpu.matmul %31, %32, %cst_20 {dimension_numbers = #tpu.dot_dimension_numbers<[1], [0], [0], [1], [0, 0, 1, 1], [], []>} : vector<16x128xbf16>, vector<128x300xbf16>, vector<16x300xf32> -> vector<16x300xf32>
    %c0_21 = arith.constant 0 : index
    %c0_22 = arith.constant 0 : index
    %34 = vector.load %arg9[%c0_21, %c0_22] : memref<1x300xf32, #tpu.memory_space<vmem>>, vector<1x300xf32>
    %35 = vector.broadcast %34 : vector<1x300xf32> to vector<16x300xf32>
    %36 = arith.addf %33, %35 : vector<16x300xf32>
    %c0_23 = arith.constant 0 : index
    %c0_24 = arith.constant 0 : index
    %37 = vector.load %arg10[%c0_23, %c0_24] : memref<16x300xf32, #tpu.memory_space<vmem>>, vector<16x300xf32>
    tpu.vector_store %arg10[%c0_23, %c0_24], %36 {strides = array<i32>} : memref<16x300xf32, #tpu.memory_space<vmem>>, vector<16x300xf32>,
    return
  }
  func.func @transform_0(%arg0: i32) -> (i32, i32) {
    %c0_i32 = arith.constant 0 : i32
    %c0_i32_0 = arith.constant 0 : i32
    return %arg0, %c0_i32 : i32, i32
  }
  func.func @transform_1(%arg0: i32) -> (i32, i32) {
    %c0_i32 = arith.constant 0 : i32
    %c0_i32_0 = arith.constant 0 : i32
    %c0_i32_1 = arith.constant 0 : i32
    return %c0_i32, %c0_i32_0 : i32, i32
  }
  func.func @transform_2(%arg0: i32) -> (i32, i32) {
    %c0_i32 = arith.constant 0 : i32
    %c0_i32_0 = arith.constant 0 : i32
    %c0_i32_1 = arith.constant 0 : i32
    return %c0_i32, %c0_i32_0 : i32, i32
  }
  func.func @transform_3(%arg0: i32) -> (i32, i32) {
    %c0_i32 = arith.constant 0 : i32
    %c0_i32_0 = arith.constant 0 : i32
    %c0_i32_1 = arith.constant 0 : i32
    return %c0_i32, %c0_i32_0 : i32, i32
  }
  func.func @transform_4(%arg0: i32) -> (i32, i32) {
    %c0_i32 = arith.constant 0 : i32
    %c0_i32_0 = arith.constant 0 : i32
    %c0_i32_1 = arith.constant 0 : i32
    return %c0_i32, %c0_i32_0 : i32, i32
  }
  func.func @transform_5(%arg0: i32) -> (i32, i32) {
    %c0_i32 = arith.constant 0 : i32
    %c0_i32_0 = arith.constant 0 : i32
    %c0_i32_1 = arith.constant 0 : i32
    return %c0_i32, %c0_i32_0 : i32, i32
  }
  func.func @transform_6(%arg0: i32) -> (i32, i32) {
    %c0_i32 = arith.constant 0 : i32
    %c0_i32_0 = arith.constant 0 : i32
    %c0_i32_1 = arith.constant 0 : i32
    return %c0_i32, %c0_i32_0 : i32, i32
  }
  func.func @transform_7(%arg0: i32) -> (i32, i32) {
    %c0_i32 = arith.constant 0 : i32
    %c0_i32_0 = arith.constant 0 : i32
    %c0_i32_1 = arith.constant 0 : i32
    return %c0_i32, %c0_i32_0 : i32, i32
  }
  func.func @transform_8(%arg0: i32) -> (i32, i32) {
    %c0_i32 = arith.constant 0 : i32
    %c0_i32_0 = arith.constant 0 : i32
    %c0_i32_1 = arith.constant 0 : i32
    return %c0_i32, %c0_i32_0 : i32, i32
  }
  func.func @transform_9(%arg0: i32) -> (i32, i32) {
    %c0_i32 = arith.constant 0 : i32
    %c0_i32_0 = arith.constant 0 : i32
    return %arg0, %c0_i32 : i32, i32
  }
}

</mosaic_0001>

<bundles_post_ra>
// kernel: mlpe_forward.1
= control target key start
LH: loop header
LB: loop body
LE: loop exit
PB: predicated region body
PF: predicated region fallthrough
CT: control target
= control target key end

     0   :  { %s1706_s0 = inlined_call_operand.vmem [shape: bf16[24,68], index: 0, kind: input, shape index: {}]   ;;  %s1707_s1 = inlined_call_operand.vmem [shape: bf16[68,128], index: 1, kind: input, shape index: {}]   ;;  %s1708_s2 = inlined_call_operand.vmem [shape: f32[1,128], index: 2, kind: input, shape index: {}]   ;;  %s1709_s3 = inlined_call_operand.vmem [shape: bf16[128,128], index: 3, kind: input, shape index: {}]   ;;  %s1710_s4 = inlined_call_operand.vmem [shape: f32[1,128], index: 4, kind: input, shape index: {}]   ;;  %s1711_s5 = inlined_call_operand.vmem [shape: bf16[128,128], index: 5, kind: input, shape index: {}]   ;;  %s1712_s6 = inlined_call_operand.vmem [shape: f32[1,128], index: 6, kind: input, shape index: {}]   ;;  %s1713_s7 = inlined_call_operand.vmem [shape: bf16[128,300], index: 7, kind: input, shape index: {}]   ;;  %s1714_s8 = inlined_call_operand.vmem [shape: f32[1,300], index: 8, kind: input, shape index: {}]   ;;  %s1715_s9 = inlined_call_operand.hbm [shape: f32[24,300], index: 9, kind: output, shape index: {}]  }
   0x1   :  { %1716 = sst [smem:[#allocation5_spill]] %s1706_s0 }
   0x2   :  { %1717 = sst [smem:[#allocation6_spill]] %s1707_s1 }
   0x3   :  { %14 = vsyncpa [#allocation3], 0 }
   0x4   :  { %16 = vsyncpa [#allocation3 + $0x1], 0  ;;  %s1356_s30 = smov 0   ;;  %s1358_s10 = smov 0  }
   0x5   :  { %s1360_s11 = smov 0   ;;  %s1362_s12 = smov 0  }
   0x6 LB: > { %s1377_s13 = sadd.s32 4294967295, %s1301_s12   ;;  %s930_s14 = sadd.s32 4294967294, %s1301_s12   ;;  %s1301_s12 = sphi %s1362_s12, %s1726_s12   ;;  %s1297_s11 = sphi %s1360_s11, %s1725_s11   ;;  %s1293_s10 = sphi %s1358_s10, %s1724_s10   ;;  %s1289_s30 = sphi %s1356_s30, %s1723_s30  }
   0x7   : > { %s1381_s15 = sadd.s32 1, %s1301_s12   ;;  %s223_s16 = sadd.s32 1, %s1297_s11 }
   0x8   : > { %s220_s17 = ssub.s32 %s1301_s12, %s1381_s15  ;;  %p233_p0 = scmp.ne.s32.totalorder %s1297_s11, %s1293_s10 }
   0x9   : > { %p221_p1 = scmp.eq.s32.totalorder %s220_s17, 0  ;;  %p234_p2 = scmp.eq.s32.totalorder %s1377_s13, 1 }
   0xa   : > { %p239_p3 = scmp.ne.s32.totalorder %s1293_s10, %s1289_s30  ;;  %p240_p4 = scmp.eq.s32.totalorder %s930_s14, 1 }
   0xb   : > { %s1392_s18 = scalar_select %p221_p1, %s1297_s11, %s223_s16  }
   0xc   : > { %p1394_p5 = por %p234_p2, %p233_p0  ;;  %p1398_p6 = por %p240_p4, %p239_p3 }
   0xd   : > { %p933_p7 = scmp.ge.s32.totalorder %s1301_s12, 1  ;;  %p299_p8 = scmp.lt.s32.totalorder %s1301_s12, 3 }
   0xf   : > { %p300_p9 = pnand %p933_p7, %p299_p8 }
  0x10   : > { %s1720_s1 = sld [smem:[#allocation6_spill]] (!%p300_p9)  ;;  %s1414_s27 = sshll.u32 (!%p300_p9), %s1377_s13, 1 }
  0x11   : > { %303 = sbr.rel (%p300_p9) target bundleno = 687 (0x2af), region = 56  ;;  %p344_p10 = scmp.lt.s32.totalorder (!%p300_p9), %s1414_s27, 2 }
  0x12   : > { %s1721_s0 = sld [smem:[#allocation5_spill]] (!%p300_p9)  ;;  %s336_s28 = sand.u32 (!%p300_p9), 1, %s1293_s10  }
  0x13   : > { %s1171_s16 = smul.u32 (!%p300_p9), 48, %s336_s28 }
  0x15   : > { %s1640_s21 = scalar_lea.vmem (!%p300_p9), [#allocation2], %s1171_s16 }
  0x16   : > { %v370_v0 = vld [vmem:[%s1720_s1 + $0x20] sm:$0x3]  ;;  %v1138_v2 = vld [vmem:[%s1709_s3 + $0x38] sm:$0xff]  ;;  %vm407_vm0 = vcmask 1041408   ;;  %v1137_v4 = vld [vmem:[%s1709_s3 + $0x30] sm:$0xff]  ;;  %s345_s17 = scalar_select %p344_p10, %s1414_s27, 2 }
  0x17   : > { %v393_v1 = vunpack.c.l.b16 %v370_v0  ;;  %508 = vmatpush.bf16.msra.mxu1 %v1138_v2  ;;  %v1130_v6 = vld [vmem:[%s1720_s1 + $0x18] sm:$0xff]  ;;  %v1129_v7 = vld [vmem:[%s1720_s1 + $0x10] sm:$0xff]  ;;  %v1128_v8 = vld [vmem:[%s1720_s1 + $0x8] sm:$0xff]  ;;  %vm403_vm1 = vcmask 556032   ;;  %vm838_vm2 = vcmask 359424   ;;  %s852_s22 = ssub.s32 (%p1394_p5), 3, %s1414_s27 }
  0x18   : > { %s935_s23 = sshll.u32 %s345_s17, 2  ;;  %v1127_v9 = vld [vmem:[%s1720_s1] sm:$0xff]  ;;  %v1136_v11 = vld [vmem:[%s1709_s3 + $0x28] sm:$0xff]  ;;  %v1134_v13 = vld [vmem:[%s1709_s3 + $0x18] sm:$0xff]  ;;  %s1648_s17 = scalar_lea.sflag [#allocation3], %s336_s28 }
  0x19   : > { %v398_v3 = vpack.c.b16 %v393_v1, %v393_v1  ;;  %s347_s29 = scalar_lea.vmem %s1721_s0, %s935_s23  ;;  %v1135_v12 = vld [vmem:[%s1709_s3 + $0x20] sm:$0xff]  ;;  %v1133_v14 = vld [vmem:[%s1709_s3 + $0x10] sm:$0xff]  ;;  %v1132_v15 = vld [vmem:[%s1709_s3 + $0x8] sm:$0xff]  ;;  %p853_p11 = scmp.lt.s32.totalorder (%p1394_p5), %s852_s22, 2 }
  0x1a   : > { %v1126_v10 = vld [vmem:[%s347_s29] sm:$0xff]  ;;  %v1146_v17 = vld [vmem:[%s1711_s5 + $0x38] sm:$0xff]  ;;  %v1145_v18 = vld [vmem:[%s1711_s5 + $0x30] sm:$0xff] }
  0x1b   : > { %v409_v5 = vsel %vm407_vm0, %v398_v3, 0  ;;  %509 = vmatpush.bf16.msra.mxu1 %v1137_v4  ;;  %v1131_v16 = vld [vmem:[%s1709_s3] sm:$0xff]  ;;  %595 = vmatpush.bf16.msra.mxu2 %v1146_v17  ;;  %v1144_v33 = vld [vmem:[%s1711_s5 + $0x28] sm:$0xff]  ;;  %v1142_v35 = vld [vmem:[%s1711_s5 + $0x18] sm:$0xff] }
  0x1c   : > { %414 = vmatpush.bf16.msra.mxu0 %v409_v5  ;;  %v1213_v19 = vld [vmem:[%s1708_s2] ss:$0 sm:$0xff]  ;;  %v1141_v36 = vld [vmem:[%s1711_s5 + $0x10] sm:$0xff]  ;;  %v1140_v37 = vld [vmem:[%s1711_s5 + $0x8] sm:$0xff] }
  0x1d   : > { %v1143_v34 = vld [vmem:[%s1711_s5 + $0x20] sm:$0xff]  ;;  %v1107_v39 = vld [vmem:[%s1713_s7 + $0xa8] sm:$0xf]  ;;  %v1169_v40 = vld [vmem:[%s1713_s7 + $0xb0] sm:$0xf0] }
  0x1e   : > { %v1139_v38 = vld [vmem:[%s1711_s5] sm:$0xff]  ;;  %v1168_v41 = vld [vmem:[%s1713_s7 + $0xac] sm:$0xf]  ;;  %v1108_v42 = vor.u32 %v1169_v40, %v1107_v39  ;;  %v1109_v43 = vld [vmem:[%s1713_s7 + $0xb4] sm:$0xf0] }
  0x1f   : > { %510 = vmatpush.bf16.msra.mxu1 %v1136_v11  ;;  %596 = vmatpush.bf16.msra.mxu2 %v1145_v18  ;;  %v1115_v44 = vld [vmem:[%s1713_s7 + $0xb0] sm:$0xf]  ;;  %v1170_v45 = vld [vmem:[%s1713_s7 + $0xb8] sm:$0xf0]  ;;  %v1112_v46 = vor.u32 %v1168_v41, %v1109_v43  ;;  %v1214_v48 = vld [vmem:[%s1710_s4] ss:$0 sm:$0xff] }
  0x20   : > { %415 = vmatpush.bf16.msra.mxu0 %v1130_v6  ;;  %v1116_v47 = vor.u32 %v1170_v45, %v1115_v44  ;;  %794 = vmatpush.bf16.msra.mxu3 %v1108_v42  ;;  %v1095_v62 = vld [vmem:[%s1713_s7 + $0x90] sm:$0xf]  ;;  %v1166_v63 = vld [vmem:[%s1713_s7 + $0x98] sm:$0xf0]  ;;  %v1165_v0 = vld [vmem:[%s1713_s7 + $0x94] sm:$0xf] }
  0x21   : > { %v1096_v1 = vor.u32 %v1166_v63, %v1095_v62  ;;  %v1097_v2 = vld [vmem:[%s1713_s7 + $0x9c] sm:$0xf0]  ;;  %v1103_v3 = vld [vmem:[%s1713_s7 + $0x98] sm:$0xf]  ;;  %v1167_v4 = vld [vmem:[%s1713_s7 + $0xa0] sm:$0xf0] }
  0x22   : > { %v1100_v5 = vor.u32 %v1165_v0, %v1097_v2  ;;  %v1104_v6 = vor.u32 %v1167_v4, %v1103_v3  ;;  %v1085_v11 = vld [vmem:[%s1713_s7 + $0x84] sm:$0xf0]  ;;  %v1160_v17 = vld [vmem:[%s1713_s7 + $0x68] sm:$0xf0]  ;;  %v1159_v18 = vld [vmem:[%s1713_s7 + $0x64] sm:$0xf] }
  0x23   : > { %511 = vmatpush.bf16.msra.mxu1 %v1135_v12  ;;  %597 = vmatpush.bf16.msra.mxu2 %v1144_v33  ;;  %v1091_v12 = vld [vmem:[%s1713_s7 + $0x80] sm:$0xf]  ;;  %v1158_v33 = vld [vmem:[%s1713_s7 + $0x58] sm:$0xf0]  ;;  %v1055_v41 = vld [vmem:[%s1713_s7 + $0x38] sm:$0xf] }
  0x24   : > { %416 = vmatpush.bf16.msra.mxu0 %v1129_v7  ;;  %795 = vmatpush.bf16.msra.mxu3 %v1096_v1  ;;  %v1083_v7 = vld [vmem:[%s1713_s7 + $0x78] sm:$0xf]  ;;  %v1049_v40 = vld [vmem:[%s1713_s7 + $0x3c] sm:$0xf0]  ;;  %v1155_v42 = vld [vmem:[%s1713_s7 + $0x40] sm:$0xf0] }
  0x25   : > { %v1056_v44 = vor.u32 %v1155_v42, %v1055_v41  ;;  %v1035_v45 = vld [vmem:[%s1713_s7 + $0x18] sm:$0xf]  ;;  %v1215_v63 = vld [vmem:[%s1712_s6] ss:$0 sm:$0xff] }
  0x27   : > { %512 = vmatpush.bf16.msra.mxu1 %v1134_v13  ;;  %598 = vmatpush.bf16.msra.mxu2 %v1143_v34  ;;  %v1164_v13 = vld [vmem:[%s1713_s7 + $0x88] sm:$0xf0] }
  0x28   : > { %417 = vmatpush.bf16.msra.mxu0 %v1128_v8  ;;  %v1163_v8 = vld [vmem:[%s1713_s7 + $0x80] sm:$0xf0] }
  0x2b   : > { %513 = vmatpush.bf16.msra.mxu1 %v1133_v14  ;;  %599 = vmatpush.bf16.msra.mxu2 %v1142_v35 }
  0x2c   : > { %418 = vmatpush.bf16.msra.mxu0 %v1127_v9  ;;  %v1162_v9 = vld [vmem:[%s1713_s7 + $0x7c] sm:$0xf] }
  0x2d   : > { %v1088_v14 = vor.u32 %v1162_v9, %v1085_v11 }
  0x2f   : > { %956 = vmatmul.msk.bf16.vlgmr.msra.gmra.mxu0 %vm403_vm1, %v1126_v10  ;;  %514 = vmatpush.bf16.msra.mxu1 %v1132_v15  ;;  %v1084_v10 = vor.u32 %v1163_v8, %v1083_v7  ;;  %v1092_v15 = vor.u32 %v1164_v13, %v1091_v12 }
  0x30   : > { %600 = vmatpush.bf16.msra.mxu2 %v1141_v36  ;;  %808 = vmatpush.bf16.msrb.mxu0 %v1112_v46  ;;  %v1047_v36 = vld [vmem:[%s1713_s7 + $0x30] sm:$0xf]  ;;  %v1151_v46 = vld [vmem:[%s1713_s7 + $0x20] sm:$0xf0] }
  0x31   : > { %796 = vmatpush.bf16.msra.mxu3 %v1084_v10 }
  0x33   : > { %515 = vmatpush.bf16.msra.mxu1 %v1131_v16  ;;  %v1071_v16 = vld [vmem:[%s1713_s7 + $0x60] sm:$0xf] }
  0x34   : > { %601 = vmatpush.bf16.msra.mxu2 %v1140_v37  ;;  %809 = vmatpush.bf16.msrb.mxu0 %v1100_v5  ;;  %v1154_v37 = vld [vmem:[%s1713_s7 + $0x38] sm:$0xf0] }
  0x35   : > { %v1048_v39 = vor.u32 %v1154_v37, %v1047_v36 }
  0x37   : > { %822 = vmatpush.bf16.msrb.mxu1 %v1116_v47  ;;  %v1150_v47 = vld [vmem:[%s1713_s7 + $0x1c] sm:$0xf] }
  0x38   : > { %602 = vmatpush.bf16.msra.mxu2 %v1139_v38  ;;  %810 = vmatpush.bf16.msrb.mxu0 %v1088_v14  ;;  %v1153_v38 = vld [vmem:[%s1713_s7 + $0x34] sm:$0xf] }
  0x39   : > { %v1052_v43 = vor.u32 %v1153_v38, %v1049_v40 }
  0x3b   : > { %823 = vmatpush.bf16.msrb.mxu1 %v1104_v6 }
  0x3f   : > { %824 = vmatpush.bf16.msrb.mxu1 %v1092_v15 }
  0xac   : > { %v1460_v20 = vpop.f32.mrf.mxu0 }
  0xad   : > { %v429_v21 = vadd.f32 %v1213_v19, %v1460_v20 }
  0xaf   : > { %v431_v22 = vmul.f32 -3.1415927, %v429_v21 }
  0xb1   : > { %v433_v23 = vmul.f32 %v431_v22, %v429_v21  ;;  %v1073_v21 = vld [vmem:[%s1713_s7 + $0x6c] sm:$0xf0]  ;;  %v1079_v22 = vld [vmem:[%s1713_s7 + $0x68] sm:$0xf] }
  0xb3   : > { %v435_v27 = vmul.f32 1.442695, %v433_v23  ;;  %v1161_v23 = vld [vmem:[%s1713_s7 + $0x70] sm:$0xf0] }
  0xb4   : > { %v1463_v24 = vpop.f32.mrf.mxu0 }
  0xb5   : > { %v430_v25 = vadd.f32 %v1213_v19, %v1463_v24  ;;  %1216 = vpow2.f32 %v435_v27  ;;  %v1072_v19 = vor.u32 %v1160_v17, %v1071_v16  ;;  %v1059_v27 = vld [vmem:[%s1713_s7 + $0x48] sm:$0xf] }
  0xb7   : > { %v432_v26 = vmul.f32 -3.1415927, %v430_v25  ;;  %797 = vmatpush.bf16.msra.mxu3 %v1072_v19 }
  0xb9   : > { %v434_v28 = vmul.f32 %v432_v26, %v430_v25  ;;  %v1076_v25 = vor.u32 %v1159_v18, %v1073_v21  ;;  %v1080_v26 = vor.u32 %v1161_v23, %v1079_v22 }
  0xbb   : > { %v437_v29 = vmul.f32 1.442695, %v434_v28  ;;  %v1217_v30 = vpop.eup %1216  ;;  %811 = vmatpush.bf16.msrb.mxu0 %v1076_v25  ;;  %825 = vmatpush.bf16.msrb.mxu1 %v1080_v26  ;;  %v1157_v28 = vld [vmem:[%s1713_s7 + $0x50] sm:$0xf0] }
  0xbd   : > { %1218 = vpow2.f32 %v437_v29  ;;  %v1156_v29 = vld [vmem:[%s1713_s7 + $0x4c] sm:$0xf] }
  0xc3   : > { %v1219_v31 = vpop.eup %1218 }
  0xc4   : > { %v439_v32 = vpack.c.bf16 %v1219_v31, %v1217_v30  ;;  %v1060_v30 = vor.u32 %v1157_v28, %v1059_v27  ;;  %v1061_v31 = vld [vmem:[%s1713_s7 + $0x54] sm:$0xf0] }
  0xc5   : > { %v1064_v34 = vor.u32 %v1156_v29, %v1061_v31 }
  0xc6   : > { %516 = vmatmul.bf16.vlgmr.msra.gmra.mxu1 %v439_v32  ;;  %v1067_v32 = vld [vmem:[%s1713_s7 + $0x50] sm:$0xf]  ;;  %798 = vmatpush.bf16.msra.mxu3 %v1060_v30 }
  0xc7   : > { %v1068_v35 = vor.u32 %v1158_v33, %v1067_v32  ;;  %812 = vmatpush.bf16.msrb.mxu0 %v1064_v34 }
  0xc9   : > { %826 = vmatpush.bf16.msrb.mxu1 %v1068_v35 }
  0xca   : > { %799 = vmatpush.bf16.msra.mxu3 %v1048_v39 }
  0xcb   : > { %813 = vmatpush.bf16.msrb.mxu0 %v1052_v43 }
  0xcd   : > { %827 = vmatpush.bf16.msrb.mxu1 %v1056_v44 }
 0x143   : > { %v517_v49 = vpop.f32.mrf.mxu1 }
 0x144   : > { %v518_v50 = vadd.f32 %v1214_v48, %v517_v49  ;;  %v1037_v49 = vld [vmem:[%s1713_s7 + $0x24] sm:$0xf0] }
 0x146   : > { %v522_v51 = vmul.f32 -3.1415927, %v518_v50 }
 0x148   : > { %v524_v52 = vmul.f32 %v522_v51, %v518_v50  ;;  %v1043_v50 = vld [vmem:[%s1713_s7 + $0x20] sm:$0xf]  ;;  %v1152_v51 = vld [vmem:[%s1713_s7 + $0x28] sm:$0xf0] }
 0x14a   : > { %v526_v56 = vmul.f32 1.442695, %v524_v52  ;;  %v1040_v52 = vor.u32 %v1150_v47, %v1037_v49 }
 0x14b   : > { %v519_v53 = vpop.f32.mrf.mxu1 }
 0x14c   : > { %v520_v54 = vadd.f32 %v1214_v48, %v519_v53  ;;  %1220 = vpow2.f32 %v526_v56  ;;  %v1036_v48 = vor.u32 %v1151_v46, %v1035_v45  ;;  %v1044_v53 = vor.u32 %v1152_v51, %v1043_v50  ;;  %v1147_v56 = vld [vmem:[%s1713_s7 + $0x4] sm:$0xf]  ;;  %814 = vmatpush.bf16.msrb.mxu0 %v1040_v52 }
 0x14e   : > { %v523_v55 = vmul.f32 -3.1415927, %v520_v54  ;;  %800 = vmatpush.bf16.msra.mxu3 %v1036_v48  ;;  %828 = vmatpush.bf16.msrb.mxu1 %v1044_v53 }
 0x150   : > { %v525_v57 = vmul.f32 %v523_v55, %v520_v54  ;;  %v1023_v54 = vld [vmem:[%s1713_s7] sm:$0xf]  ;;  %v1148_v55 = vld [vmem:[%s1713_s7 + $0x8] sm:$0xf0] }
 0x152   : > { %v528_v58 = vmul.f32 1.442695, %v525_v57  ;;  %v1221_v59 = vpop.eup %1220  ;;  %v1024_v57 = vor.u32 %v1148_v55, %v1023_v54 }
 0x154   : > { %1222 = vpow2.f32 %v528_v58  ;;  %v1025_v58 = vld [vmem:[%s1713_s7 + $0xc] sm:$0xf0]  ;;  %801 = vmatpush.bf16.msra.mxu3 %v1024_v57 }
 0x15a   : > { %v1223_v60 = vpop.eup %1222 }
 0x15b   : > { %v530_v61 = vpack.c.bf16 %v1223_v60, %v1221_v59  ;;  %v1031_v59 = vld [vmem:[%s1713_s7 + $0x8] sm:$0xf]  ;;  %v1149_v60 = vld [vmem:[%s1713_s7 + $0x10] sm:$0xf0] }
 0x15c   : > { %v1032_v62 = vor.u32 %v1149_v60, %v1031_v59 }
 0x15d   : > { %603 = vmatmul.bf16.vlgmr.msra.gmra.mxu2 %v530_v61  ;;  %v1028_v61 = vor.u32 %v1147_v56, %v1025_v58 }
 0x15e   : > { %829 = vmatpush.bf16.msrb.mxu1 %v1032_v62 }
 0x15f   : > { %815 = vmatpush.bf16.msrb.mxu0 %v1028_v61 }
 0x1e0   : > { %v604_v0 = vpop.f32.mrf.mxu2 }
 0x1e1   : > { %v609_v1 = vadd.f32 %v604_v0, %v1460_v20  ;;  %v658_v20 = vld [vmem:[%s1714_s8] sm:$0x7] }
 0x1e2   : > { %v662_v15 = vperm.slane %v658_v20, 2  ;;  %v660_v21 = vperm.slane %v658_v20, 0 }
 0x1e3   : > { %v615_v2 = vadd.f32 %v1215_v63, %v609_v1 }
 0x1e5   : > { %v617_v3 = vmul.f32 -3.1415927, %v615_v2 }
 0x1e7   : > { %v619_v6 = vmul.f32 %v617_v3, %v615_v2 }
 0x1e8   : > { %v606_v4 = vpop.f32.mrf.mxu2 }
 0x1e9   : > { %v610_v5 = vadd.f32 %v606_v4, %v1463_v24  ;;  %v621_v9 = vmul.f32 1.442695, %v619_v6  ;;  %v661_v24 = vperm.slane %v658_v20, 1 }
 0x1eb   : > { %v616_v7 = vadd.f32 %v1215_v63, %v610_v5  ;;  %1224 = vpow2.f32 %v621_v9 }
 0x1ed   : > { %v618_v8 = vmul.f32 -3.1415927, %v616_v7 }
 0x1ef   : > { %v620_v10 = vmul.f32 %v618_v8, %v616_v7 }
 0x1f1   : > { %v623_v11 = vmul.f32 1.442695, %v620_v10  ;;  %v1225_v12 = vpop.eup %1224 }
 0x1f3   : > { %1226 = vpow2.f32 %v623_v11 }
 0x1f9   : > { %v1227_v13 = vpop.eup %1226 }
 0x1fa   : > { %v625_v14 = vpack.c.bf16 %v1227_v13, %v1225_v12 }
 0x1fc   : > { %802 = vmatmul.bf16.vlgmr.msra.gmra.mxu3 %v625_v14  ;;  %816 = vmatmul.bf16.vlgmr.msrb.gmra.mxu0 %v625_v14 }
 0x1fd   : > { %830 = vmatmul.bf16.vlgmr.msrb.gmra.mxu1 %v625_v14 }
 0x279   : > { %v817_v16 = vpop.f32.mrf.mxu0 }
 0x27a   : > { %v818_v17 = vadd.f32 %v817_v16, %v661_v24  ;;  %v831_v18 = vpop.f32.mrf.mxu1 }
 0x27b   : > { %v832_v19 = vadd.f32 %v831_v18, %v662_v15 }
 0x27c   : > { %837 = vst [vmem:[%s1640_s21 + $0x8] sm:$0xff] %v818_v17 }
 0x27d   : > { %839 = vst.msk [vmem:[%s1640_s21 + $0x10] sm:$0xff] %vm838_vm2, %v832_v19 }
 0x27f   : > { %v803_v22 = vpop.f32.mrf.mxu3 }
 0x280   : > { %v804_v23 = vadd.f32 %v803_v22, %v660_v21 }
 0x281   : > { %v819_v25 = vpop.f32.mrf.mxu0 }
 0x282   : > { %836 = vst [vmem:[%s1640_s21] sm:$0xff] %v804_v23  ;;  %v820_v26 = vadd.f32 %v819_v25, %v661_v24  ;;  %v833_v27 = vpop.f32.mrf.mxu1 }
 0x283   : > { %v834_v28 = vadd.f32 %v833_v27, %v662_v15 }
 0x284   : > { %841 = vst [vmem:[%s1640_s21 + $0x20] sm:$0xff] %v820_v26 }
 0x285   : > { %842 = vst.msk [vmem:[%s1640_s21 + $0x28] sm:$0xff] %vm838_vm2, %v834_v28 }
 0x286   : > { %850 = sbr.rel (!%p1394_p5) target bundleno = 687 (0x2af), region = 60 }
 0x287   : > { %v805_v29 = vpop.f32.mrf.mxu3 }
 0x288   : > { %v806_v30 = vadd.f32 %v805_v29, %v660_v21 }
 0x28a   : > { %840 = vst [vmem:[%s1640_s21 + $0x18] sm:$0xff] %v806_v30 }
 0x28b   : > { %s1728_s22 = smov (!%p853_p11, %s852_s22), 2 }
 0x28c   : > { %s1119_s24 = smul.u32 24, %s1728_s22 }
 0x28e   : > { %s857_s23 = ssub.s32 48, %s1119_s24 }
 0x28f   : > { %s858_s25 = sshll.u32 %s857_s23, 4 }
 0x290   : > { %859 = vsyncadd %s1648_s17, %s858_s25  ;;  %p1654_p12 = scmp.ne.s32.totalorder %s1119_s24, 0  ;;  %s1172_s28 = smul.u32 48, %s1377_s13 }
 0x291   : > { %s865_s29 = sshll.u32 %s1640_s21, 4  ;;  %s1660_s19 = smul.u32 384, %s1728_s22  ;;  %s1665_s29 = int_to_ptr.vmem [resolvable:$true] %s865_s29 }
 0x292   : > { %s863_s27 = scalar_lea.hbm %s1715_s9, %s1172_s28  ;;  %s1228_s24 = sshra.s32 %s1665_s29, 4  ;;  %s1229_s24 = int_to_ptr.vmem [resolvable:$true] %s1228_s24 }
 0x293   : > { %s867_s23 = sshll.u32 %s863_s27, 4  ;;  %s1230_s25 = sshrl.u32 %s1660_s19, 4  ;;  %s1667_s23 = int_to_ptr.hbm [resolvable:$true] %s867_s23 }
 0x294   : > { %s1266_s13 = sshll.u32 %s1230_s25, 4  ;;  %s1233_s21 = sadd.s32 1, %s1230_s25 }
 0x295   : > { %p1232_p13 = scmp.ne.s32.totalorder %s1266_s13, %s1660_s19  ;;  %s1303_s14 = smov [#allocation2]  }
 0x296   : > { %s1239_s28 = scalar_lea.vmem %s1303_s14, 96 }
 0x297   : > { %s1730_s21 = smov (!%p1232_p13, %s1233_s21), %s1230_s25 }
 0x298   : > { %s1235_s22 = scalar_lea.vmem %s1229_s24, %s1730_s21 }
 0x299   : > { %p1236_p0 = scmp.ne.s32.totalorder %s1229_s24, %s1235_s22  ;;  %p1241_p3 = scmp.lt.s32.totalorder %s1239_s28, %s1235_s22 }
 0x29b   : > { %p1237_p1 = pnand %p1236_p0, %p1654_p12 }
 0x29d   : > { %p1238_p2 = pneg %p1237_p1 }
 0x29f   : > { %p1243_p4 = pnand %p1241_p3, %p1238_p2 }
 0x2a1   : > { %1246 = shalt.err (!%p1243_p4)
}
 0x2a2   : > { %s1247_s16 = sshra.s32 %s1667_s23, 4  ;;  %s1258_s24 = scalar_lea.hbm %s1715_s9, 72  ;;  %s1248_s16 = int_to_ptr.hbm [resolvable:$true] %s1247_s16 }
 0x2a3   : > { %s1254_s27 = scalar_lea.hbm %s1248_s16, %s1730_s21  ;;  %p1259_p9 = scmp.lt.s32.totalorder %s1248_s16, %s1715_s9 }
 0x2a4   : > { %p1255_p5 = scmp.ne.s32.totalorder %s1248_s16, %s1254_s27  ;;  %p1260_p10 = scmp.lt.s32.totalorder %s1258_s24, %s1254_s27 }
 0x2a6   : > { %p1256_p7 = pnand %p1255_p5, %p1654_p12  ;;  %p1261_p11 = por %p1260_p10, %p1259_p9 }
 0x2a8   : > { %p1257_p8 = pneg %p1256_p7 }
 0x2aa   : > { %p1262_p13 = pnand %p1261_p11, %p1257_p8 }
 0x2ac   : > { %1265 = shalt.err (!%p1262_p13)
}
 0x2ad   : > { %s1304_s22 = smov 384   ;;  %s1305_s21 = smov 24  }
 0x2ae   : > { %873 = dma.vmem_to_hbm [thread:$0]  (%p1654_p12), %s1665_s29, %s1660_s19, %s1667_s23, %s1648_s17, %s1304_s22, %s1304_s22, %s1305_s21  }
 0x2af PF: > { %p1178_p0 = scmp.ge.s32.totalorder %s1301_s12, 2  ;;  %s882_s0 = sand.u32 1, %s1289_s30  }
 0x2b0   : > { %s883_s1 = scalar_lea.sflag [#allocation3], %s882_s0 }
 0x2b1   : > { %p1175_p1 = pnand %p1178_p0, %p1398_p6 }
 0x2b3   : > { %p1176_p2 = pneg %p1175_p1 }
 0x2b5   : > { %1284 = dma.done.wait (%p1176_p2), %s883_s1, 768  }
 0x2b6   : > { %1286 = vsyncadd (%p1176_p2), %s883_s1, 4294966528  ;;  %p19_p3 = scmp.ge.s32.totalorder %s1381_s15, 4   ;;  %s1723_s30 = smov %s1293_s10 }
 0x2b7   : > { %s1724_s10 = smov %s1297_s11  ;;  %s1725_s11 = smov %s1392_s18 }
 0x2b8   : > { %s1726_s12 = smov %s1381_s15  ;;  %21 = sbr.rel (!%p19_p3) target bundleno = 6 (0x6), region = 91 }
 0x2bd   :  { %889 = vsyncpa [#allocation3], 1 }
 0x2be   :  { %891 = vsyncpa [#allocation3 + $0x1], 1 }

</bundles_post_ra>
